<compile_context>
chip_gen: v7x
topology: tpu7x:2x2x1
jax: 0.10.0
libtpu: 0.0.40
codegen_flags: <defaults>
</compile_context>

<pallas_src>
import functools

import jax
import jax.numpy as jnp
from jax.experimental import pallas as pl
from jax.experimental.pallas import tpu as pltpu

_LANES = 128


def _round_up(x, m):
    return ((x + m - 1) // m) * m


def _sample_kernel(num_actions, logits_ref, u_ref, probs_ref, actions_ref, logp_ref):
    """Per-tile categorical sampling from a single shared probability row.

    logits_ref  : VMEM (1, AP)   f32  (AP = lane-padded action dim, pads = -1e30)
    u_ref       : VMEM (TB, 128) f32  uniforms in [0, 1), one per sample
    probs_ref   : VMEM (1, 1, AP) f32 per-tile copy of the probability row
    actions_ref : VMEM (TB, 128) int32
    logp_ref    : VMEM (TB, 128) f32
    """
    # ---- softmax over the (padded) action axis: O(AP), shared by all samples ----
    logits = logits_ref[...]                                  # (1, AP)
    m = jnp.max(logits, axis=-1, keepdims=True)
    e = jnp.exp(logits - m)                                   # pads -> exp(-huge) = 0
    z = jnp.sum(e, axis=-1, keepdims=True)
    p_row = e / z                                             # (1, AP)
    probs_ref[...] = p_row[None]                              # (1, 1, AP)

    u = u_ref[...]                                            # (TB, 128)

    # ---- inverse-CDF sample: action = #{ j < n-1 : u >= cdf_j } ------------------
    # Pure lane-dense VALU work; cdf_j accumulated as a (1,1) scalar per action.
    action = jnp.zeros(u.shape, dtype=jnp.int32)
    cdf = jnp.zeros((1, 1), dtype=jnp.float32)
    for j in range(num_actions - 1):                          # unrolled (tiny n)
        cdf = cdf + p_row[:, j:j + 1]
        action = action + (u >= cdf).astype(jnp.int32)
    actions_ref[...] = action                                 # in [0, num_actions)

    # ---- log-prob of the chosen action: select-chain over the few actions --------
    logp_row = jnp.log(jnp.maximum(p_row, 1e-30))             # (1, AP), computed once
    logp = jnp.zeros(u.shape, dtype=jnp.float32)
    for j in range(num_actions):                              # unrolled
        logp = logp + jnp.where(action == j, logp_row[:, j:j + 1], 0.0)
    logp_ref[...] = logp


def agent_one_action_selector(action_distribution, batch_size, key):
    """JAX/Pallas equivalent of AgentOneActionSelector.forward(batch_size).

    action_distribution : (1, num_actions) f32 parameter
    batch_size          : python int
    key                 : jax PRNG key (randomness source for the categorical draw)
    returns (actions (B,) int32, log_probs (B,) f32, probs (B, num_actions) f32)
    """
    num_actions = int(action_distribution.shape[-1])
    B = int(batch_size)

    # Lane-pad the action axis so every block is lane-dense.
    AP = _round_up(max(num_actions, _LANES), _LANES)

    # Map the batch onto (rows, 128): lane-dense samples, sublane-tiled grid.
    rows = max(1, (B + _LANES - 1) // _LANES)
    rows8 = _round_up(rows, 8)
    TB = min(rows8, 128)                     # sublane rows per grid step (mult of 8)
    rows_pad = _round_up(rows8, TB)
    grid = rows_pad // TB

    # Padded logits: softmax gives exactly 0 on the pad lanes.
    logits = jnp.full((1, AP), -1e30, dtype=jnp.float32)
    logits = logits.at[:, :num_actions].set(
        action_distribution.astype(jnp.float32).reshape(1, num_actions))

    # One uniform per (padded) sample, generated host-side (portable: no in-kernel
    # PRNG, which has no interpret/CPU lowering).
    u = jax.random.uniform(key, (rows_pad, _LANES), dtype=jnp.float32)

    kernel = functools.partial(_sample_kernel, num_actions)

    probs_tiles, actions_pad, logp_pad = pl.pallas_call(
        kernel,
        out_shape=(
            jax.ShapeDtypeStruct((grid, 1, AP), jnp.float32),     # per-tile prob row
            jax.ShapeDtypeStruct((rows_pad, _LANES), jnp.int32),  # actions
            jax.ShapeDtypeStruct((rows_pad, _LANES), jnp.float32) # log-probs
        ),
        grid=(grid,),
        in_specs=[
            pl.BlockSpec((1, AP), lambda i: (0, 0)),          # shared logits row
            pl.BlockSpec((TB, _LANES), lambda i: (i, 0)),     # per-tile uniforms
        ],
        out_specs=(
            pl.BlockSpec((1, 1, AP), lambda i: (i, 0, 0)),    # per-tile prob row
            pl.BlockSpec((TB, _LANES), lambda i: (i, 0)),     # lane-dense actions
            pl.BlockSpec((TB, _LANES), lambda i: (i, 0)),     # lane-dense log-probs
        ),
        compiler_params=pltpu.CompilerParams(
            dimension_semantics=("parallel",),
            vmem_limit_bytes=32 * 1024 * 1024,
        ),
    )(logits, u)

    actions = actions_pad.reshape(-1)[:B]
    log_probs = logp_pad.reshape(-1)[:B]
    p_row = probs_tiles[0, 0, :num_actions]
    probs = jnp.broadcast_to(p_row[None, :], (B, num_actions))  # lazy expand
    return actions, log_probs, probs


if __name__ == "__main__":
    num_actions = 5
    batch_size = 8

    # Deterministic parameter init, exactly as the module's __init__:
    # nn.Parameter(torch.zeros(1, num_actions)).fill_(1 / num_actions)
    action_distribution = jnp.full((1, num_actions), 1.0 / num_actions,
                                   dtype=jnp.float32)

    key = jax.random.PRNGKey(0)

    actions, log_probs, probs = agent_one_action_selector(
        action_distribution, batch_size, key)
    jax.block_until_ready((actions, log_probs, probs))

    # Sanity checks: uniform logits -> uniform probs; actions in range.
    assert probs.shape == (batch_size, num_actions)
    assert actions.shape == (batch_size,)
    assert log_probs.shape == (batch_size,)
    assert bool(jnp.all(jnp.abs(probs - 1.0 / num_actions) < 1e-5))
    assert bool(jnp.all((actions >= 0) & (actions < num_actions)))
    assert bool(jnp.all(jnp.abs(log_probs - jnp.log(1.0 / num_actions)) < 1e-4))

    print("KERNEL_OK")
</pallas_src>

<mosaic_0001>
module attributes {stable_mosaic.version = 11 : i64} {
  func.func @_sample_kernel(%arg0: i32, %arg1: memref<1x128xf32, #tpu.memory_space<vmem>>, %arg2: memref<8x128xf32, #tpu.memory_space<vmem>>, %arg3: memref<1x1x128xf32, #tpu.memory_space<vmem>>, %arg4: memref<8x128xi32, #tpu.memory_space<vmem>>, %arg5: memref<8x128xf32, #tpu.memory_space<vmem>>) attributes {dimension_semantics = [#tpu.dimension_semantics<parallel>], iteration_bounds = array<i64: 1>, scalar_prefetch = 0 : i64, scratch_operands = 0 : i64, tpu.core_type = #tpu.core_type<tc>, window_params = [{pipeline_mode = #tpu.pipeline_mode<synchronous>, transform_indices = @transform_0, window_bounds = array<i64: 1, 128>}, {transform_indices = @transform_1, window_bounds = array<i64: 8, 128>}, {transform_indices = @transform_2, window_bounds = array<i64: 1, 1, 128>}, {transform_indices = @transform_3, window_bounds = array<i64: 8, 128>}, {transform_indices = @transform_4, window_bounds = array<i64: 8, 128>}]} {
    %c0 = arith.constant 0 : index
    %c0_0 = arith.constant 0 : index
    %0 = vector.load %arg1[%c0, %c0_0] : memref<1x128xf32, #tpu.memory_space<vmem>>, vector<1x128xf32>
    %cst = arith.constant dense<0xFF800000> : vector<1xf32>
    %1 = vector.multi_reduction <maximumf>, %0, %cst [1] : vector<1x128xf32> to vector<1xf32>
    %2 = vector.shape_cast %1 : vector<1xf32> to vector<1x1xf32>
    %3 = vector.broadcast %2 : vector<1x1xf32> to vector<1x128xf32>
    %4 = arith.subf %0, %3 : vector<1x128xf32>
    %5 = math.exp %4 : vector<1x128xf32>
    %cst_1 = arith.constant dense<0.000000e+00> : vector<1xf32>
    %6 = vector.multi_reduction <add>, %5, %cst_1 [1] : vector<1x128xf32> to vector<1xf32>
    %7 = vector.shape_cast %6 : vector<1xf32> to vector<1x1xf32>
    %8 = vector.broadcast %7 : vector<1x1xf32> to vector<1x128xf32>
    %9 = arith.divf %5, %8 : vector<1x128xf32>
    %10 = vector.shape_cast %9 : vector<1x128xf32> to vector<1x1x128xf32>
    %c0_2 = arith.constant 0 : index
    %c0_3 = arith.constant 0 : index
    %c0_4 = arith.constant 0 : index
    %11 = vector.load %arg3[%c0_2, %c0_3, %c0_4] : memref<1x1x128xf32, #tpu.memory_space<vmem>>, vector<1x1x128xf32>
    tpu.vector_store %arg3[%c0_2, %c0_3, %c0_4], %10 {strides = array<i32>} : memref<1x1x128xf32, #tpu.memory_space<vmem>>, vector<1x1x128xf32>,
    %c0_5 = arith.constant 0 : index
    %c0_6 = arith.constant 0 : index
    %12 = vector.load %arg2[%c0_5, %c0_6] : memref<8x128xf32, #tpu.memory_space<vmem>>, vector<8x128xf32>
    %c0_i32 = arith.constant 0 : i32
    %13 = vector.broadcast %c0_i32 : i32 to vector<8x128xi32>
    %cst_7 = arith.constant 0.000000e+00 : f32
    %14 = vector.broadcast %cst_7 : f32 to vector<1x1xf32>
    %15 = vector.extract_strided_slice %9 {offsets = [0, 0], sizes = [1, 1], strides = [1, 1]} : vector<1x128xf32> to vector<1x1xf32>
    %16 = arith.addf %14, %15 : vector<1x1xf32>
    %17 = vector.broadcast %16 : vector<1x1xf32> to vector<8x128xf32>
    %18 = arith.cmpf oge, %12, %17 : vector<8x128xf32>
    %19 = arith.extui %18 : vector<8x128xi1> to vector<8x128xi32>
    %20 = arith.addi %13, %19 : vector<8x128xi32>
    %21 = vector.extract_strided_slice %9 {offsets = [0, 1], sizes = [1, 1], strides = [1, 1]} : vector<1x128xf32> to vector<1x1xf32>
    %22 = arith.addf %16, %21 : vector<1x1xf32>
    %23 = vector.broadcast %22 : vector<1x1xf32> to vector<8x128xf32>
    %24 = arith.cmpf oge, %12, %23 : vector<8x128xf32>
    %25 = arith.extui %24 : vector<8x128xi1> to vector<8x128xi32>
    %26 = arith.addi %20, %25 : vector<8x128xi32>
    %27 = vector.extract_strided_slice %9 {offsets = [0, 2], sizes = [1, 1], strides = [1, 1]} : vector<1x128xf32> to vector<1x1xf32>
    %28 = arith.addf %22, %27 : vector<1x1xf32>
    %29 = vector.broadcast %28 : vector<1x1xf32> to vector<8x128xf32>
    %30 = arith.cmpf oge, %12, %29 : vector<8x128xf32>
    %31 = arith.extui %30 : vector<8x128xi1> to vector<8x128xi32>
    %32 = arith.addi %26, %31 : vector<8x128xi32>
    %33 = vector.extract_strided_slice %9 {offsets = [0, 3], sizes = [1, 1], strides = [1, 1]} : vector<1x128xf32> to vector<1x1xf32>
    %34 = arith.addf %28, %33 : vector<1x1xf32>
    %35 = vector.broadcast %34 : vector<1x1xf32> to vector<8x128xf32>
    %36 = arith.cmpf oge, %12, %35 : vector<8x128xf32>
    %37 = arith.extui %36 : vector<8x128xi1> to vector<8x128xi32>
    %38 = arith.addi %32, %37 : vector<8x128xi32>
    %c0_8 = arith.constant 0 : index
    %c0_9 = arith.constant 0 : index
    %39 = vector.load %arg4[%c0_8, %c0_9] : memref<8x128xi32, #tpu.memory_space<vmem>>, vector<8x128xi32>
    tpu.vector_store %arg4[%c0_8, %c0_9], %38 {strides = array<i32>} : memref<8x128xi32, #tpu.memory_space<vmem>>, vector<8x128xi32>,
    %cst_10 = arith.constant 1.000000e-30 : f32
    %40 = vector.broadcast %cst_10 : f32 to vector<1x128xf32>
    %41 = arith.maximumf %9, %40 : vector<1x128xf32>
    %42 = math.log %41 : vector<1x128xf32>
    %cst_11 = arith.constant 0.000000e+00 : f32
    %43 = vector.broadcast %cst_11 : f32 to vector<8x128xf32>
    %c0_i32_12 = arith.constant 0 : i32
    %44 = vector.broadcast %c0_i32_12 : i32 to vector<8x128xi32>
    %45 = arith.cmpi eq, %38, %44 : vector<8x128xi32>
    %46 = vector.extract_strided_slice %42 {offsets = [0, 0], sizes = [1, 1], strides = [1, 1]} : vector<1x128xf32> to vector<1x1xf32>
    %cst_13 = arith.constant 0.000000e+00 : f32
    %47 = vector.shape_cast %46 : vector<1x1xf32> to vector<1x1xf32>
    %48 = vector.broadcast %47 : vector<1x1xf32> to vector<8x128xf32>
    %49 = vector.broadcast %cst_13 : f32 to vector<8x128xf32>
    %50 = arith.select %45, %48, %49 : vector<8x128xi1>, vector<8x128xf32>
    %51 = arith.addf %43, %50 : vector<8x128xf32>
    %c1_i32 = arith.constant 1 : i32
    %52 = vector.broadcast %c1_i32 : i32 to vector<8x128xi32>
    %53 = arith.cmpi eq, %38, %52 : vector<8x128xi32>
    %54 = vector.extract_strided_slice %42 {offsets = [0, 1], sizes = [1, 1], strides = [1, 1]} : vector<1x128xf32> to vector<1x1xf32>
    %cst_14 = arith.constant 0.000000e+00 : f32
    %55 = vector.shape_cast %54 : vector<1x1xf32> to vector<1x1xf32>
    %56 = vector.broadcast %55 : vector<1x1xf32> to vector<8x128xf32>
    %57 = vector.broadcast %cst_14 : f32 to vector<8x128xf32>
    %58 = arith.select %53, %56, %57 : vector<8x128xi1>, vector<8x128xf32>
    %59 = arith.addf %51, %58 : vector<8x128xf32>
    %c2_i32 = arith.constant 2 : i32
    %60 = vector.broadcast %c2_i32 : i32 to vector<8x128xi32>
    %61 = arith.cmpi eq, %38, %60 : vector<8x128xi32>
    %62 = vector.extract_strided_slice %42 {offsets = [0, 2], sizes = [1, 1], strides = [1, 1]} : vector<1x128xf32> to vector<1x1xf32>
    %cst_15 = arith.constant 0.000000e+00 : f32
    %63 = vector.shape_cast %62 : vector<1x1xf32> to vector<1x1xf32>
    %64 = vector.broadcast %63 : vector<1x1xf32> to vector<8x128xf32>
    %65 = vector.broadcast %cst_15 : f32 to vector<8x128xf32>
    %66 = arith.select %61, %64, %65 : vector<8x128xi1>, vector<8x128xf32>
    %67 = arith.addf %59, %66 : vector<8x128xf32>
    %c3_i32 = arith.constant 3 : i32
    %68 = vector.broadcast %c3_i32 : i32 to vector<8x128xi32>
    %69 = arith.cmpi eq, %38, %68 : vector<8x128xi32>
    %70 = vector.extract_strided_slice %42 {offsets = [0, 3], sizes = [1, 1], strides = [1, 1]} : vector<1x128xf32> to vector<1x1xf32>
    %cst_16 = arith.constant 0.000000e+00 : f32
    %71 = vector.shape_cast %70 : vector<1x1xf32> to vector<1x1xf32>
    %72 = vector.broadcast %71 : vector<1x1xf32> to vector<8x128xf32>
    %73 = vector.broadcast %cst_16 : f32 to vector<8x128xf32>
    %74 = arith.select %69, %72, %73 : vector<8x128xi1>, vector<8x128xf32>
    %75 = arith.addf %67, %74 : vector<8x128xf32>
    %c4_i32 = arith.constant 4 : i32
    %76 = vector.broadcast %c4_i32 : i32 to vector<8x128xi32>
    %77 = arith.cmpi eq, %38, %76 : vector<8x128xi32>
    %78 = vector.extract_strided_slice %42 {offsets = [0, 4], sizes = [1, 1], strides = [1, 1]} : vector<1x128xf32> to vector<1x1xf32>
    %cst_17 = arith.constant 0.000000e+00 : f32
    %79 = vector.shape_cast %78 : vector<1x1xf32> to vector<1x1xf32>
    %80 = vector.broadcast %79 : vector<1x1xf32> to vector<8x128xf32>
    %81 = vector.broadcast %cst_17 : f32 to vector<8x128xf32>
    %82 = arith.select %77, %80, %81 : vector<8x128xi1>, vector<8x128xf32>
    %83 = arith.addf %75, %82 : vector<8x128xf32>
    %c0_18 = arith.constant 0 : index
    %c0_19 = arith.constant 0 : index
    %84 = vector.load %arg5[%c0_18, %c0_19] : memref<8x128xf32, #tpu.memory_space<vmem>>, vector<8x128xf32>
    tpu.vector_store %arg5[%c0_18, %c0_19], %83 {strides = array<i32>} : memref<8x128xf32, #tpu.memory_space<vmem>>, vector<8x128xf32>,
    return
  }
  func.func @transform_0(%arg0: i32) -> (i32, i32) {
    %c0_i32 = arith.constant 0 : i32
    %c0_i32_0 = arith.constant 0 : i32
    %c0_i32_1 = arith.constant 0 : i32
    return %c0_i32, %c0_i32_0 : i32, i32
  }
  func.func @transform_1(%arg0: i32) -> (i32, i32) {
    %c0_i32 = arith.constant 0 : i32
    %c0_i32_0 = arith.constant 0 : i32
    return %arg0, %c0_i32 : i32, i32
  }
  func.func @transform_2(%arg0: i32) -> (i32, i32, i32) {
    %c0_i32 = arith.constant 0 : i32
    %c0_i32_0 = arith.constant 0 : i32
    %c0_i32_1 = arith.constant 0 : i32
    return %arg0, %c0_i32, %c0_i32_0 : i32, i32, i32
  }
  func.func @transform_3(%arg0: i32) -> (i32, i32) {
    %c0_i32 = arith.constant 0 : i32
    %c0_i32_0 = arith.constant 0 : i32
    return %arg0, %c0_i32 : i32, i32
  }
  func.func @transform_4(%arg0: i32) -> (i32, i32) {
    %c0_i32 = arith.constant 0 : i32
    %c0_i32_0 = arith.constant 0 : i32
    return %arg0, %c0_i32 : i32, i32
  }
}

</mosaic_0001>

<bundles_post_ra>
// kernel: tpu_custom_call.1
= control target key start
LH: loop header
LB: loop body
LE: loop exit
PB: predicated region body
PF: predicated region fallthrough
CT: control target
= control target key end

     0   :  { %10 = vsyncpa [#allocation3], 0  ;;  %s450_s0 = inlined_call_operand.hbm [shape: f32[1,128], index: 0, kind: input, shape index: {}]   ;;  %s451_s1 = inlined_call_operand.hbm [shape: f32[8,128], index: 1, kind: input, shape index: {}]   ;;  %s452_s2 = inlined_call_operand.hbm [shape: f32[1,1,128], index: 2, kind: output, shape index: {0}]   ;;  %s453_s3 = inlined_call_operand.hbm [shape: s32[8,128], index: 3, kind: output, shape index: {1}]   ;;  %s454_s4 = inlined_call_operand.hbm [shape: f32[8,128], index: 4, kind: output, shape index: {2}]  }
   0x1   :  { %11 = vsyncpa [#allocation6], 0 }
   0x2   :  { %12 = vsyncpa [#allocation4], 0 }
   0x3   :  { %13 = vsyncpa [#allocation9], 0  ;;  %s347_s15 = smov [#allocation2]   ;;  %s348_s17 = smov [#allocation5]  }
   0x4   :  { %s20_s16 = sshll.u32 %s347_s15, 4  ;;  %s30_s18 = sshll.u32 %s348_s17, 4  ;;  %s21_s16 = int_to_ptr.vmem [resolvable:$true] %s20_s16  ;;  %s31_s18 = int_to_ptr.vmem [resolvable:$true] %s30_s18 }
   0x5   :  { %s229_s21 = scalar_lea.hbm %s450_s0, 16 }
   0x6   :  { %p230_p0 = scmp.ne.s32.totalorder %s450_s0, %s229_s21  ;;  %p233_p1 = scmp.lt.u32.totalorder %s229_s21, %s450_s0 }
   0x8   :  { %p235_p2 = pnand %p233_p1, %p230_p0 }
   0xa   :  { %238 = shalt.err (!%p235_p2)
}
   0xb   :  { %s239_s26 = scalar_lea.vmem %s21_s16, 16  ;;  %s243_s27 = scalar_lea.vmem %s21_s16, 32 }
   0xc   :  { %p240_p3 = scmp.ne.s32.totalorder %s21_s16, %s239_s26  ;;  %p244_p4 = scmp.lt.s32.totalorder %s21_s16, %s21_s16 }
   0xd   :  { %p245_p5 = scmp.lt.s32.totalorder %s243_s27, %s239_s26 }
   0xf   :  { %p246_p6 = por %p245_p5, %p244_p4 }
  0x11   :  { %p247_p7 = pnand %p246_p6, %p240_p3 }
  0x13   :  { %250 = shalt.err (!%p247_p7)
}
  0x14   :  { %23 = dma.hbm_to_vmem [thread:$0]  %s450_s0, 16, %s21_s16, [#allocation3]  }
  0x15   :  { %s251_s6 = scalar_lea.hbm %s451_s1, 128 }
  0x16   :  { %p252_p8 = scmp.ne.s32.totalorder %s451_s1, %s251_s6  ;;  %p255_p9 = scmp.lt.u32.totalorder %s251_s6, %s451_s1 }
  0x18   :  { %p257_p10 = pnand %p255_p9, %p252_p8 }
  0x1a   :  { %260 = shalt.err (!%p257_p10)
}
  0x1b   :  { %s261_s11 = scalar_lea.vmem %s31_s18, 128  ;;  %p266_p12 = scmp.lt.s32.totalorder %s31_s18, %s31_s18 }
  0x1c   :  { %p262_p11 = scmp.ne.s32.totalorder %s31_s18, %s261_s11  ;;  %p267_p13 = scmp.lt.s32.totalorder %s261_s11, %s261_s11 }
  0x1e   :  { %p268_p0 = por %p267_p13, %p266_p12 }
  0x20   :  { %p269_p1 = pnand %p268_p0, %p262_p11 }
  0x22   :  { %272 = shalt.err (!%p269_p1)
}
  0x23   :  { %33 = dma.hbm_to_vmem [thread:$0]  %s451_s1, 128, %s31_s18, [#allocation6]  }
  0x24   :  { %339 = dma.done.wait [#allocation3], 16  }
  0x25   :  { %340 = vsyncadd [#allocation3], 4294967280 }
  0x26   :  { %341 = dma.done.wait [#allocation6], 128  }
  0x27   :  { %342 = vsyncadd [#allocation6], 4294967168  ;;  %vm41_vm0 = vcmask 1040384   ;;  %v40_v0 = vld [vmem:[#allocation2] sm:$0x1]  ;;  %v349_v7 = vmov 0   ;;  %v57_v10 = vlaneseq }
  0x28   :  { %v42_v1 = vsel %vm41_vm0, %v40_v0, -inf  ;;  %217 = vset.pattern.permute.xlu1 %v349_v7  ;;  %v350_v8 = vmov 2   ;;  %s351_s1 = smov 125   ;;  %s352_s13 = smov 127   ;;  %v354_v20 = vmov 4   ;;  %v355_v30 = vmov 1  }
  0x29   :  { %43 = vmax.xlane.f32.xlu0 %v42_v1  ;;  %v58_v13 = vshrl.u32 %v57_v10, 7  ;;  %s353_s14 = smov 126   ;;  %v356_v31 = vmov 3   ;;  %s357_s15 = smov [#allocation7]  }
  0x2a   :  { %219 = vset.pattern.permute.xlu0 %v350_v8  ;;  %s167_s16 = sshll.u32 %s357_s15, 4  ;;  %s168_s16 = int_to_ptr.vmem [resolvable:$true] %s167_s16 }
  0x2b   :  { %v59_v15 = vsub.s32 0, %v58_v13  ;;  %s273_s17 = scalar_lea.vmem %s168_s16, 16  ;;  %s277_s18 = scalar_lea.vmem %s168_s16, 32 }
  0x2c   :  { %p274_p2 = scmp.ne.s32.totalorder %s168_s16, %s273_s17  ;;  %p278_p3 = scmp.lt.s32.totalorder %s168_s16, %s168_s16 }
  0x2d   :  { %p279_p4 = scmp.lt.s32.totalorder %s277_s18, %s273_s17 }
  0x2f   :  { %p280_p5 = por %p279_p4, %p278_p3 }
  0x31   :  { %p281_p6 = pnand %p280_p5, %p274_p2 }
  0xb6   :  { %v44_v2 = vpop.xlane.xlu0 %43 }
  0xb7   :  { %v45_v3 = vsub.f32 %v40_v0, %v44_v2 }
  0xb9   :  { %v46_v4 = vmul.f32 1.442695, %v45_v3 }
  0xbb   :  { %223 = vpow2.f32 %v46_v4 }
  0xc5   :  { %v224_v5 = vpop.eup %223 }
  0xc6   :  { %v48_v6 = vsel %vm41_vm0, %v224_v5, 0.0 }
  0xc7   :  { %49 = vadd.xlane.f32.xlu0 %v48_v6 }
 0x154   :  { %v50_v9 = vpop.xlane.xlu0 %49 }
 0x155   :  { %225 = vrcp.f32 %v50_v9 }
 0x15f   :  { %v226_v11 = vpop.eup %225 }
 0x160   :  { %v52_v12 = vmul.f32 %v226_v11, %v224_v5 }
 0x162   :  { %53 = vst [vmem:[#allocation7] sm:$0x1] %v52_v12  ;;  %100 = vrot.lane.b32.xlu0 %v52_v12, %s351_s1  ;;  %68 = vrot.lane.b32.xlu1 %v52_v12, %s352_s13  ;;  %v117_v14 = vmax.f32 %v52_v12, 1e-30  ;;  %v60_v16 = vrot.slane %v52_v12, %v59_v15 }
 0x164   :  { %227 = vlog2.f32 %v117_v14 }
 0x166   :  { %84 = vrot.lane.b32.xlu1 %v52_v12, %s353_s14 }
 0x16a   :  { %62 = vperm.xlu1 %217, %v60_v16  }
 0x16e   :  { %v228_v17 = vpop.eup %227 }
 0x16f   :  { %v119_v18 = vmul.f32 0.6931472, %v228_v17 }
 0x171   :  { %v125_v19 = vrot.slane %v119_v18, %v59_v15 }
 0x173   :  { %141 = vperm.xlu0 %219, %v125_v19   ;;  %127 = vperm.xlu1 %217, %v125_v19  }
 0x177   :  { %222 = vset.pattern.permute.xlu0 %v354_v20 }
 0x1d4   :  { %v69_v21 = vpop.permute.xlu1 %68  ;;  %v101_v26 = vpop.permute.xlu0 %100 }
 0x1d5   :  { %v71_v22 = vadd.f32 %v69_v21, %v52_v12 }
 0x1d7   :  { %v76_v23 = vrot.slane %v71_v22, %v59_v15 }
 0x1d8   :  { %v85_v24 = vpop.permute.xlu1 %84 }
 0x1d9   :  { %v87_v25 = vadd.f32 %v85_v24, %v71_v22  ;;  %78 = vperm.xlu1 %217, %v76_v23  }
 0x1db   :  { %v92_v27 = vrot.slane %v87_v25, %v59_v15  ;;  %v103_v28 = vadd.f32 %v101_v26, %v87_v25 }
 0x1dd   :  { %94 = vperm.xlu1 %217, %v92_v27   ;;  %v108_v29 = vrot.slane %v103_v28, %v59_v15 }
 0x1e1   :  { %110 = vperm.xlu1 %217, %v108_v29  }
 0x1e5   :  { %218 = vset.pattern.permute.xlu1 %v355_v30 }
 0x1e6   :  { %134 = vperm.xlu1 %218, %v125_v19  }
 0x1ea   :  { %220 = vset.pattern.permute.xlu1 %v356_v31 }
 0x1eb   :  { %148 = vperm.xlu1 %220, %v125_v19  }
 0x1ef   :  { %221 = vset.pattern.permute.xlu1 %v354_v20 }
 0x1f0   :  { %155 = vperm.xlu1 %221, %v125_v19  }
 0x1f1   :  { %284 = shalt.err (!%p281_p6)
}
 0x1f2   :  { %s285_s21 = scalar_lea.hbm %s452_s2, 16 }
 0x1f3   :  { %p286_p7 = scmp.ne.s32.totalorder %s452_s2, %s285_s21  ;;  %p289_p8 = scmp.lt.u32.totalorder %s285_s21, %s452_s2 }
 0x1f5   :  { %p291_p9 = pnand %p289_p8, %p286_p7 }
 0x1f7   :  { %294 = shalt.err (!%p291_p9)
}
 0x1f8   :  { %170 = dma.vmem_to_hbm [thread:$0]  %s168_s16, 16, %s452_s2, [#allocation4]   ;;  %v63_v32 = vpop.permute.xlu1 %62  ;;  %v54_v34 = vld [vmem:[#allocation5] sm:$0xff] }
 0x1f9   :  { %vm65_vm2 = vcmp.ge.f32.partialorder %v54_v34, %v63_v32  ;;  %s358_s28 = smov [#allocation8]  }
 0x1fa   :  { %v66_v38 = vsel %vm65_vm2, 1, %v349_v7  ;;  %s177_s29 = sshll.u32 %s358_s28, 4  ;;  %s178_s29 = int_to_ptr.vmem [resolvable:$true] %s177_s29 }
 0x1fb   :  { %s295_s2 = scalar_lea.vmem %s178_s29, 128  ;;  %p300_p11 = scmp.lt.s32.totalorder %s178_s29, %s178_s29 }
 0x1fc   :  { %v128_v33 = vpop.permute.xlu1 %127  ;;  %p296_p10 = scmp.ne.s32.totalorder %s178_s29, %s295_s2  ;;  %p301_p12 = scmp.lt.s32.totalorder %s295_s2, %s295_s2 }
 0x1fe   :  { %p302_p13 = por %p301_p12, %p300_p11 }
 0x200   :  { %p303_p0 = pnand %p302_p13, %p296_p10 }
 0x258   :  { %v79_v35 = vpop.permute.xlu1 %78 }
 0x259   :  { %vm81_vm1 = vcmp.ge.f32.partialorder %v54_v34, %v79_v35 }
 0x25a   :  { %v82_v36 = vsel %vm81_vm1, 1, %v349_v7 }
 0x25b   :  { %v83_v40 = vadd.s32 %v82_v36, %v66_v38 }
 0x25c   :  { %v95_v37 = vpop.permute.xlu1 %94 }
 0x25d   :  { %vm97_vm3 = vcmp.ge.f32.partialorder %v54_v34, %v95_v37 }
 0x25e   :  { %v98_v39 = vsel %vm97_vm3, 1, %v349_v7 }
 0x25f   :  { %v99_v42 = vadd.s32 %v98_v39, %v83_v40 }
 0x260   :  { %v111_v41 = vpop.permute.xlu1 %110 }
 0x261   :  { %vm113_vm4 = vcmp.ge.f32.partialorder %v54_v34, %v111_v41 }
 0x262   :  { %v114_v43 = vsel %vm113_vm4, 1, %v349_v7 }
 0x263   :  { %v115_v44 = vadd.s32 %v114_v43, %v99_v42 }
 0x265   :  { %116 = vst [vmem:[#allocation8] sm:$0xff] %v115_v44  ;;  %vm120_vm5 = vcmp.eq.s32.totalorder %v115_v44, 0  ;;  %vm132_vm6 = vcmp.eq.s32.totalorder %v115_v44, 1  ;;  %v135_v45 = vpop.permute.xlu1 %134 }
 0x266   :  { %v130_v46 = vsel %vm120_vm5, %v128_v33, 0.0  ;;  %v137_v47 = vsel %vm132_vm6, %v135_v45, 0.0 }
 0x267   :  { %306 = shalt.err (!%p303_p0)
}
 0x268   :  { %s307_s6 = scalar_lea.hbm %s453_s3, 128 }
 0x269   :  { %p308_p1 = scmp.ne.s32.totalorder %s453_s3, %s307_s6  ;;  %p311_p2 = scmp.lt.u32.totalorder %s307_s6, %s453_s3 }
 0x26b   :  { %p313_p3 = pnand %p311_p2, %p308_p1 }
 0x26d   :  { %316 = shalt.err (!%p313_p3)
}
 0x26e   :  { %180 = dma.vmem_to_hbm [thread:$0]  %s178_s29, 128, %s453_s3, [#allocation9]   ;;  %v138_v48 = vadd.f32 %v137_v47, %v130_v46  ;;  %vm139_vm7 = vcmp.eq.s32.totalorder %v115_v44, 2  ;;  %v142_v49 = vpop.permute.xlu0 %141  ;;  %v149_v51 = vpop.permute.xlu1 %148  ;;  %vm146_vm8 = vcmp.eq.s32.totalorder %v115_v44, 3  ;;  %vm153_vm9 = vcmp.eq.s32.totalorder %v115_v44, 4 }
 0x26f   :  { %v144_v50 = vsel %vm139_vm7, %v142_v49, 0.0  ;;  %v151_v53 = vsel %vm146_vm8, %v149_v51, 0.0  ;;  %s359_s12 = smov [#allocation10]  }
 0x270   :  { %v145_v52 = vadd.f32 %v144_v50, %v138_v48  ;;  %s187_s1 = sshll.u32 %s359_s12, 4  ;;  %s188_s1 = int_to_ptr.vmem [resolvable:$true] %s187_s1 }
 0x271   :  { %s317_s13 = scalar_lea.vmem %s188_s1, 128  ;;  %p322_p5 = scmp.lt.s32.totalorder %s188_s1, %s188_s1 }
 0x272   :  { %v152_v54 = vadd.f32 %v151_v53, %v145_v52  ;;  %v156_v55 = vpop.permute.xlu1 %155  ;;  %p318_p4 = scmp.ne.s32.totalorder %s188_s1, %s317_s13  ;;  %p323_p6 = scmp.lt.s32.totalorder %s317_s13, %s317_s13 }
 0x273   :  { %v158_v56 = vsel %vm153_vm9, %v156_v55, 0.0 }
 0x274   :  { %v159_v57 = vadd.f32 %v158_v56, %v152_v54  ;;  %p324_p7 = por %p323_p6, %p322_p5 }
 0x276   :  { %160 = vst [vmem:[#allocation10] sm:$0xff] %v159_v57  ;;  %p325_p8 = pnand %p324_p7, %p318_p4 }
 0x278   :  { %328 = shalt.err (!%p325_p8)
}
 0x279   :  { %s329_s15 = scalar_lea.hbm %s454_s4, 128 }
 0x27a   :  { %p330_p9 = scmp.ne.s32.totalorder %s454_s4, %s329_s15  ;;  %p333_p10 = scmp.lt.u32.totalorder %s329_s15, %s454_s4 }
 0x27c   :  { %p335_p11 = pnand %p333_p10, %p330_p9 }
 0x27e   :  { %338 = shalt.err (!%p335_p11)
}
 0x27f   :  { %190 = dma.vmem_to_hbm [thread:$0]  %s188_s1, 128, %s454_s4, [#allocation9]  }
 0x280   :  { %343 = dma.done.wait [#allocation4], 16  }
 0x281   :  { %344 = vsyncadd [#allocation4], 4294967280 }
 0x282   :  { %345 = dma.done.wait [#allocation9], 256  }
 0x283   :  { %346 = vsyncadd [#allocation9], 4294967040 }
 0x284   :  { %200 = vsyncpa [#allocation3], 1 }
 0x285   :  { %201 = vsyncpa [#allocation6], 1 }
 0x286   :  { %202 = vsyncpa [#allocation4], 1 }
 0x287   :  { %203 = vsyncpa [#allocation9], 1 }

</bundles_post_ra>
